<compile_context>
chip_gen: v7x
topology: tpu7x:2x2x1
jax: 0.10.0
libtpu: 0.0.40
codegen_flags: <defaults>
</compile_context>

<pallas_src>
from functools import partial

import jax
import jax.numpy as jnp
import numpy as np
from jax.experimental import pallas as pl
from jax.experimental.pallas import tpu as pltpu

GROUPS = 32
EPS = 1e-5


def up_conv_kernel(x_ref, w_ref, b_ref, gamma_ref, beta_ref, o_ref, *, num_groups):
    # x_ref:     (1, Hi+2, Wi+2, Cin)  bf16, original-resolution sample + 1-px halo
    # w_ref:     (9*Cin, 4*Cout)       bf16, upsample-phase-folded conv weights
    # b_ref:     (1, 4*Cout)           f32 (bias tiled over the 4 phases)
    # gamma_ref: (1, Cout)             f32
    # beta_ref:  (1, Cout)             f32
    # o_ref:     (1, Hi*Wi, 4*Cout)    f32, phase-major conv+GN+ReLU output
    Hp, Wp, Cin = x_ref.shape[1], x_ref.shape[2], x_ref.shape[3]
    Hi, Wi = Hp - 2, Wp - 2
    hw = Hi * Wi
    Cout = gamma_ref.shape[1]
    G = num_groups
    cpg = Cout // G

    # --- im2col slab over the ORIGINAL-resolution padded sample (K = 9*Cin) ---
    taps = []
    for dh in range(3):
        for dw in range(3):
            taps.append(x_ref[0, dh:dh + Hi, dw:dw + Wi, :].reshape(hw, Cin))
    slab = jnp.concatenate(taps, axis=-1)                   # (hw, 9*Cin) bf16

    # --- all 4 upsample phases in one MXU matmul: K=9*Cin, N=4*Cout ---
    acc = jnp.dot(slab, w_ref[...], preferred_element_type=jnp.float32)
    acc = acc + b_ref[...]                                   # (hw, 4*Cout) f32

    # --- GroupNorm, two-pass (centered) statistics, all f32 ---
    cnt = 4.0 * hw * cpg                                     # elems per group

    def phase_fold(v):                                       # (1,4*Cout)->(1,Cout)
        return (v[:, 0 * Cout:1 * Cout] + v[:, 1 * Cout:2 * Cout]
                + v[:, 2 * Cout:3 * Cout] + v[:, 3 * Cout:4 * Cout])

    def group_fold(v):                                       # share stats in group
        if cpg == 1:
            return v
        gs = jnp.sum(v.reshape(G, cpg), axis=1, keepdims=True)      # (G, 1)
        return jnp.broadcast_to(gs, (G, cpg)).reshape(1, Cout)

    s_c = phase_fold(jnp.sum(acc, axis=0, keepdims=True))    # (1, Cout)
    mean_c = group_fold(s_c) / cnt                           # (1, Cout)
    mean_all = jnp.concatenate([mean_c] * 4, axis=-1)        # (1, 4*Cout)

    d = acc - mean_all                                       # centered
    ss_c = phase_fold(jnp.sum(d * d, axis=0, keepdims=True)) # (1, Cout)
    var_c = group_fold(ss_c) / cnt
    rstd_c = jax.lax.rsqrt(var_c + EPS)

    scale_all = jnp.concatenate([rstd_c * gamma_ref[...]] * 4, axis=-1)
    shift_all = jnp.concatenate([beta_ref[...]] * 4, axis=-1)

    # --- affine + ReLU, lane-dense store (last dim = 4*Cout) ---
    o_ref[0] = jnp.maximum(d * scale_all + shift_all, 0.0)


@partial(jax.jit, static_argnames=("num_groups",))
def up_conv_forward(x_nchw, w_hwio, bias, gamma, beta, num_groups=GROUPS):
    """x_nchw: (N, Cin, Hi, Wi) f32. Returns (N, Cout, 2*Hi, 2*Wi) f32."""
    N, Cin, Hi, Wi = x_nchw.shape
    Cout = w_hwio.shape[3]
    assert Cout % num_groups == 0, "Cout must be divisible by num_groups"
    hw = Hi * Wi

    # Fold the 2x nearest upsample into the 3x3 conv: 4 output phases, each a
    # <=2x2-tap conv over the original image, packed as a (9*Cin, 4*Cout) matrix
    # addressed by im2col slot (dh, dw) of the 1-px padded original image.
    wfold = jnp.zeros((3, 3, Cin, 4, Cout), dtype=jnp.float32)
    for pr in range(2):
        for pc in range(2):
            p = pr * 2 + pc
            for kh in range(3):
                dh = (pr + kh - 1) // 2 + 1
                for kw in range(3):
                    dw = (pc + kw - 1) // 2 + 1
                    wfold = wfold.at[dh, dw, :, p, :].add(w_hwio[kh, kw])
    w_all = wfold.reshape(9 * Cin, 4 * Cout).astype(jnp.bfloat16)

    # Original-resolution input: NCHW -> NHWC, bf16, 1-px zero halo (no 2x blow-up).
    x_pad = jnp.pad(jnp.transpose(x_nchw.astype(jnp.bfloat16), (0, 2, 3, 1)),
                    ((0, 0), (1, 1), (1, 1), (0, 0)))

    bias_all = jnp.tile(bias.astype(jnp.float32).reshape(1, Cout), (1, 4))
    g2 = gamma.astype(jnp.float32).reshape(1, Cout)
    be2 = beta.astype(jnp.float32).reshape(1, Cout)

    kern = partial(up_conv_kernel, num_groups=num_groups)
    out = pl.pallas_call(
        kern,
        out_shape=jax.ShapeDtypeStruct((N, hw, 4 * Cout), jnp.float32),
        grid=(N,),
        in_specs=[
            pl.BlockSpec((1, Hi + 2, Wi + 2, Cin), lambda n: (n, 0, 0, 0)),
            pl.BlockSpec((9 * Cin, 4 * Cout), lambda n: (0, 0)),
            pl.BlockSpec((1, 4 * Cout), lambda n: (0, 0)),
            pl.BlockSpec((1, Cout), lambda n: (0, 0)),
            pl.BlockSpec((1, Cout), lambda n: (0, 0)),
        ],
        out_specs=pl.BlockSpec((1, hw, 4 * Cout), lambda n: (n, 0, 0)),
        compiler_params=pltpu.CompilerParams(
            dimension_semantics=("parallel",),
            vmem_limit_bytes=32 * 1024 * 1024),
    )(x_pad, w_all, bias_all, g2, be2)

    # Depth-to-space (phase de-interleave) + NCHW: wrapper-side layout plumbing.
    out = out.reshape(N, Hi, Wi, 2, 2, Cout)          # [n, i, j, pr, pc, c]
    out = jnp.transpose(out, (0, 5, 1, 3, 2, 4))      # [n, c, i, pr, j, pc]
    return out.reshape(N, Cout, 2 * Hi, 2 * Wi)


def ref_forward(x_nchw, w_hwio, bias, gamma, beta, num_groups=GROUPS):
    """Pure-JAX f32 reference mirroring the PyTorch module."""
    xu = jnp.repeat(jnp.repeat(x_nchw, 2, axis=2), 2, axis=3)
    y = jax.lax.conv_general_dilated(
        xu, w_hwio, window_strides=(1, 1), padding="SAME",
        dimension_numbers=("NCHW", "HWIO", "NCHW"))
    y = y + bias[None, :, None, None]
    N, C, H, W = y.shape
    yg = y.reshape(N, num_groups, C // num_groups, H, W)
    mean = yg.mean(axis=(2, 3, 4), keepdims=True)
    var = yg.var(axis=(2, 3, 4), keepdims=True)
    yn = ((yg - mean) / jnp.sqrt(var + EPS)).reshape(N, C, H, W)
    yn = yn * gamma[None, :, None, None] + beta[None, :, None, None]
    return jnp.maximum(yn, 0.0)


if __name__ == "__main__":
    key = jax.random.PRNGKey(0)
    k1, k2, k3, k4, k5 = jax.random.split(key, 5)

    N, in_ch, Hi, Wi = 2, 16, 8, 8
    out_ch = 32  # must be divisible by groups=32

    x = jax.random.normal(k1, (N, in_ch, Hi, Wi), dtype=jnp.float32)
    # conv weight stored in HWIO layout: (3, 3, in_ch, out_ch)
    w = jax.random.normal(k2, (3, 3, in_ch, out_ch), dtype=jnp.float32) * 0.1
    b = jax.random.normal(k3, (out_ch,), dtype=jnp.float32) * 0.1
    gamma = 1.0 + 0.05 * jax.random.normal(k4, (out_ch,), dtype=jnp.float32)
    beta = 0.05 * jax.random.normal(k5, (out_ch,), dtype=jnp.float32)

    out = jax.block_until_ready(up_conv_forward(x, w, b, gamma, beta))
    ref = jax.block_until_ready(ref_forward(x, w, b, gamma, beta))

    # bf16 matmul operands => looser tolerance than the pure-f32 reference.
    np.testing.assert_allclose(np.asarray(out), np.asarray(ref),
                               rtol=5e-2, atol=5e-2)
    print("KERNEL_OK")
</pallas_src>

<mosaic_0001>
module attributes {stable_mosaic.version = 11 : i64} {
  func.func @up_conv_kernel(%arg0: i32, %arg1: memref<1x10x10x16xbf16, #tpu.memory_space<vmem>>, %arg2: memref<144x128xbf16, #tpu.memory_space<vmem>>, %arg3: memref<1x128xf32, #tpu.memory_space<vmem>>, %arg4: memref<1x32xf32, #tpu.memory_space<vmem>>, %arg5: memref<1x32xf32, #tpu.memory_space<vmem>>, %arg6: memref<1x64x128xf32, #tpu.memory_space<vmem>>) attributes {dimension_semantics = [#tpu.dimension_semantics<parallel>], iteration_bounds = array<i64: 2>, scalar_prefetch = 0 : i64, scratch_operands = 0 : i64, tpu.core_type = #tpu.core_type<tc>, window_params = [{transform_indices = @transform_0, window_bounds = array<i64: 1, 10, 10, 16>}, {pipeline_mode = #tpu.pipeline_mode<synchronous>, transform_indices = @transform_1, window_bounds = array<i64: 144, 128>}, {pipeline_mode = #tpu.pipeline_mode<synchronous>, transform_indices = @transform_2, window_bounds = array<i64: 1, 128>}, {pipeline_mode = #tpu.pipeline_mode<synchronous>, transform_indices = @transform_3, window_bounds = array<i64: 1, 32>}, {pipeline_mode = #tpu.pipeline_mode<synchronous>, transform_indices = @transform_4, window_bounds = array<i64: 1, 32>}, {transform_indices = @transform_5, window_bounds = array<i64: 1, 64, 128>}]} {
    %c0 = arith.constant 0 : index
    %c0_0 = arith.constant 0 : index
    %c0_1 = arith.constant 0 : index
    %c0_2 = arith.constant 0 : index
    %0 = vector.load %arg1[%c0, %c0_0, %c0_1, %c0_2] : memref<1x10x10x16xbf16, #tpu.memory_space<vmem>>, vector<1x8x8x16xbf16>
    %1 = vector.shape_cast %0 : vector<1x8x8x16xbf16> to vector<8x8x16xbf16>
    %2 = vector.shape_cast %1 : vector<8x8x16xbf16> to vector<64x16xbf16>
    %c0_3 = arith.constant 0 : index
    %c0_4 = arith.constant 0 : index
    %c1 = arith.constant 1 : index
    %c0_5 = arith.constant 0 : index
    %3 = vector.load %arg1[%c0_3, %c0_4, %c1, %c0_5] : memref<1x10x10x16xbf16, #tpu.memory_space<vmem>>, vector<1x8x8x16xbf16>
    %4 = vector.shape_cast %3 : vector<1x8x8x16xbf16> to vector<8x8x16xbf16>
    %5 = vector.shape_cast %4 : vector<8x8x16xbf16> to vector<64x16xbf16>
    %c0_6 = arith.constant 0 : index
    %c0_7 = arith.constant 0 : index
    %c2 = arith.constant 2 : index
    %c0_8 = arith.constant 0 : index
    %6 = vector.load %arg1[%c0_6, %c0_7, %c2, %c0_8] : memref<1x10x10x16xbf16, #tpu.memory_space<vmem>>, vector<1x8x8x16xbf16>
    %7 = vector.shape_cast %6 : vector<1x8x8x16xbf16> to vector<8x8x16xbf16>
    %8 = vector.shape_cast %7 : vector<8x8x16xbf16> to vector<64x16xbf16>
    %c0_9 = arith.constant 0 : index
    %c1_10 = arith.constant 1 : index
    %c0_11 = arith.constant 0 : index
    %c0_12 = arith.constant 0 : index
    %9 = vector.load %arg1[%c0_9, %c1_10, %c0_11, %c0_12] : memref<1x10x10x16xbf16, #tpu.memory_space<vmem>>, vector<1x8x8x16xbf16>
    %10 = vector.shape_cast %9 : vector<1x8x8x16xbf16> to vector<8x8x16xbf16>
    %11 = vector.shape_cast %10 : vector<8x8x16xbf16> to vector<64x16xbf16>
    %c0_13 = arith.constant 0 : index
    %c1_14 = arith.constant 1 : index
    %c1_15 = arith.constant 1 : index
    %c0_16 = arith.constant 0 : index
    %12 = vector.load %arg1[%c0_13, %c1_14, %c1_15, %c0_16] : memref<1x10x10x16xbf16, #tpu.memory_space<vmem>>, vector<1x8x8x16xbf16>
    %13 = vector.shape_cast %12 : vector<1x8x8x16xbf16> to vector<8x8x16xbf16>
    %14 = vector.shape_cast %13 : vector<8x8x16xbf16> to vector<64x16xbf16>
    %c0_17 = arith.constant 0 : index
    %c1_18 = arith.constant 1 : index
    %c2_19 = arith.constant 2 : index
    %c0_20 = arith.constant 0 : index
    %15 = vector.load %arg1[%c0_17, %c1_18, %c2_19, %c0_20] : memref<1x10x10x16xbf16, #tpu.memory_space<vmem>>, vector<1x8x8x16xbf16>
    %16 = vector.shape_cast %15 : vector<1x8x8x16xbf16> to vector<8x8x16xbf16>
    %17 = vector.shape_cast %16 : vector<8x8x16xbf16> to vector<64x16xbf16>
    %c0_21 = arith.constant 0 : index
    %c2_22 = arith.constant 2 : index
    %c0_23 = arith.constant 0 : index
    %c0_24 = arith.constant 0 : index
    %18 = vector.load %arg1[%c0_21, %c2_22, %c0_23, %c0_24] : memref<1x10x10x16xbf16, #tpu.memory_space<vmem>>, vector<1x8x8x16xbf16>
    %19 = vector.shape_cast %18 : vector<1x8x8x16xbf16> to vector<8x8x16xbf16>
    %20 = vector.shape_cast %19 : vector<8x8x16xbf16> to vector<64x16xbf16>
    %c0_25 = arith.constant 0 : index
    %c2_26 = arith.constant 2 : index
    %c1_27 = arith.constant 1 : index
    %c0_28 = arith.constant 0 : index
    %21 = vector.load %arg1[%c0_25, %c2_26, %c1_27, %c0_28] : memref<1x10x10x16xbf16, #tpu.memory_space<vmem>>, vector<1x8x8x16xbf16>
    %22 = vector.shape_cast %21 : vector<1x8x8x16xbf16> to vector<8x8x16xbf16>
    %23 = vector.shape_cast %22 : vector<8x8x16xbf16> to vector<64x16xbf16>
    %c0_29 = arith.constant 0 : index
    %c2_30 = arith.constant 2 : index
    %c2_31 = arith.constant 2 : index
    %c0_32 = arith.constant 0 : index
    %24 = vector.load %arg1[%c0_29, %c2_30, %c2_31, %c0_32] : memref<1x10x10x16xbf16, #tpu.memory_space<vmem>>, vector<1x8x8x16xbf16>
    %25 = vector.shape_cast %24 : vector<1x8x8x16xbf16> to vector<8x8x16xbf16>
    %26 = vector.shape_cast %25 : vector<8x8x16xbf16> to vector<64x16xbf16>
    %27 = tpu.concatenate %2, %5, %8, %11, %14, %17, %20, %23, %26 in 1 : vector<64x16xbf16>, vector<64x16xbf16>, vector<64x16xbf16>, vector<64x16xbf16>, vector<64x16xbf16>, vector<64x16xbf16>, vector<64x16xbf16>, vector<64x16xbf16>, vector<64x16xbf16> -> vector<64x144xbf16>
    %c0_33 = arith.constant 0 : index
    %c0_34 = arith.constant 0 : index
    %28 = vector.load %arg2[%c0_33, %c0_34] : memref<144x128xbf16, #tpu.memory_space<vmem>>, vector<144x128xbf16>
    %cst = arith.constant dense<0.000000e+00> : vector<64x128xf32>
    %29 = tpu.matmul %27, %28, %cst {dimension_numbers = #tpu.dot_dimension_numbers<[1], [0], [0], [1], [0, 0, 1, 1], [], []>} : vector<64x144xbf16>, vector<144x128xbf16>, vector<64x128xf32> -> vector<64x128xf32>
    %c0_35 = arith.constant 0 : index
    %c0_36 = arith.constant 0 : index
    %30 = vector.load %arg3[%c0_35, %c0_36] : memref<1x128xf32, #tpu.memory_space<vmem>>, vector<1x128xf32>
    %31 = vector.broadcast %30 : vector<1x128xf32> to vector<64x128xf32>
    %32 = arith.addf %29, %31 : vector<64x128xf32>
    %cst_37 = arith.constant dense<0.000000e+00> : vector<128xf32>
    %33 = vector.multi_reduction <add>, %32, %cst_37 [0] : vector<64x128xf32> to vector<128xf32>
    %34 = vector.shape_cast %33 : vector<128xf32> to vector<1x128xf32>
    %35 = vector.extract_strided_slice %34 {offsets = [0, 0], sizes = [1, 32], strides = [1, 1]} : vector<1x128xf32> to vector<1x32xf32>
    %36 = vector.extract_strided_slice %34 {offsets = [0, 32], sizes = [1, 32], strides = [1, 1]} : vector<1x128xf32> to vector<1x32xf32>
    %37 = arith.addf %35, %36 : vector<1x32xf32>
    %38 = vector.extract_strided_slice %34 {offsets = [0, 64], sizes = [1, 32], strides = [1, 1]} : vector<1x128xf32> to vector<1x32xf32>
    %39 = arith.addf %37, %38 : vector<1x32xf32>
    %40 = vector.extract_strided_slice %34 {offsets = [0, 96], sizes = [1, 32], strides = [1, 1]} : vector<1x128xf32> to vector<1x32xf32>
    %41 = arith.addf %39, %40 : vector<1x32xf32>
    %cst_38 = arith.constant 2.560000e+02 : f32
    %42 = vector.broadcast %cst_38 : f32 to vector<1x32xf32>
    %43 = arith.divf %41, %42 : vector<1x32xf32>
    %44 = tpu.concatenate %43, %43, %43, %43 in 1 : vector<1x32xf32>, vector<1x32xf32>, vector<1x32xf32>, vector<1x32xf32> -> vector<1x128xf32>
    %45 = vector.broadcast %44 : vector<1x128xf32> to vector<64x128xf32>
    %46 = arith.subf %32, %45 : vector<64x128xf32>
    %47 = arith.mulf %46, %46 : vector<64x128xf32>
    %cst_39 = arith.constant dense<0.000000e+00> : vector<128xf32>
    %48 = vector.multi_reduction <add>, %47, %cst_39 [0] : vector<64x128xf32> to vector<128xf32>
    %49 = vector.shape_cast %48 : vector<128xf32> to vector<1x128xf32>
    %50 = vector.extract_strided_slice %49 {offsets = [0, 0], sizes = [1, 32], strides = [1, 1]} : vector<1x128xf32> to vector<1x32xf32>
    %51 = vector.extract_strided_slice %49 {offsets = [0, 32], sizes = [1, 32], strides = [1, 1]} : vector<1x128xf32> to vector<1x32xf32>
    %52 = arith.addf %50, %51 : vector<1x32xf32>
    %53 = vector.extract_strided_slice %49 {offsets = [0, 64], sizes = [1, 32], strides = [1, 1]} : vector<1x128xf32> to vector<1x32xf32>
    %54 = arith.addf %52, %53 : vector<1x32xf32>
    %55 = vector.extract_strided_slice %49 {offsets = [0, 96], sizes = [1, 32], strides = [1, 1]} : vector<1x128xf32> to vector<1x32xf32>
    %56 = arith.addf %54, %55 : vector<1x32xf32>
    %cst_40 = arith.constant 2.560000e+02 : f32
    %57 = vector.broadcast %cst_40 : f32 to vector<1x32xf32>
    %58 = arith.divf %56, %57 : vector<1x32xf32>
    %cst_41 = arith.constant 9.99999974E-6 : f32
    %59 = vector.broadcast %cst_41 : f32 to vector<1x32xf32>
    %60 = arith.addf %58, %59 : vector<1x32xf32>
    %61 = math.rsqrt %60 : vector<1x32xf32>
    %c0_42 = arith.constant 0 : index
    %c0_43 = arith.constant 0 : index
    %62 = vector.load %arg4[%c0_42, %c0_43] : memref<1x32xf32, #tpu.memory_space<vmem>>, vector<1x32xf32>
    %63 = arith.mulf %61, %62 : vector<1x32xf32>
    %64 = tpu.concatenate %63, %63, %63, %63 in 1 : vector<1x32xf32>, vector<1x32xf32>, vector<1x32xf32>, vector<1x32xf32> -> vector<1x128xf32>
    %c0_44 = arith.constant 0 : index
    %c0_45 = arith.constant 0 : index
    %65 = vector.load %arg5[%c0_44, %c0_45] : memref<1x32xf32, #tpu.memory_space<vmem>>, vector<1x32xf32>
    %66 = tpu.concatenate %65, %65, %65, %65 in 1 : vector<1x32xf32>, vector<1x32xf32>, vector<1x32xf32>, vector<1x32xf32> -> vector<1x128xf32>
    %67 = vector.broadcast %64 : vector<1x128xf32> to vector<64x128xf32>
    %68 = arith.mulf %46, %67 : vector<64x128xf32>
    %69 = vector.broadcast %66 : vector<1x128xf32> to vector<64x128xf32>
    %70 = arith.addf %68, %69 : vector<64x128xf32>
    %cst_46 = arith.constant 0.000000e+00 : f32
    %71 = vector.broadcast %cst_46 : f32 to vector<64x128xf32>
    %72 = arith.maximumf %70, %71 : vector<64x128xf32>
    %c0_47 = arith.constant 0 : index
    %c0_48 = arith.constant 0 : index
    %c0_49 = arith.constant 0 : index
    %73 = vector.load %arg6[%c0_47, %c0_48, %c0_49] : memref<1x64x128xf32, #tpu.memory_space<vmem>>, vector<1x64x128xf32>
    %74 = vector.shape_cast %73 : vector<1x64x128xf32> to vector<64x128xf32>
    %75 = vector.shape_cast %72 : vector<64x128xf32> to vector<1x64x128xf32>
    tpu.vector_store %arg6[%c0_47, %c0_48, %c0_49], %75 {strides = array<i32>} : memref<1x64x128xf32, #tpu.memory_space<vmem>>, vector<1x64x128xf32>,
    return
  }
  func.func @transform_0(%arg0: i32) -> (i32, i32, i32, i32) {
    %c0_i32 = arith.constant 0 : i32
    %c0_i32_0 = arith.constant 0 : i32
    %c0_i32_1 = arith.constant 0 : i32
    %c0_i32_2 = arith.constant 0 : i32
    return %arg0, %c0_i32, %c0_i32_0, %c0_i32_1 : i32, i32, i32, i32
  }
  func.func @transform_1(%arg0: i32) -> (i32, i32) {
    %c0_i32 = arith.constant 0 : i32
    %c0_i32_0 = arith.constant 0 : i32
    %c0_i32_1 = arith.constant 0 : i32
    return %c0_i32, %c0_i32_0 : i32, i32
  }
  func.func @transform_2(%arg0: i32) -> (i32, i32) {
    %c0_i32 = arith.constant 0 : i32
    %c0_i32_0 = arith.constant 0 : i32
    %c0_i32_1 = arith.constant 0 : i32
    return %c0_i32, %c0_i32_0 : i32, i32
  }
  func.func @transform_3(%arg0: i32) -> (i32, i32) {
    %c0_i32 = arith.constant 0 : i32
    %c0_i32_0 = arith.constant 0 : i32
    %c0_i32_1 = arith.constant 0 : i32
    return %c0_i32, %c0_i32_0 : i32, i32
  }
  func.func @transform_4(%arg0: i32) -> (i32, i32) {
    %c0_i32 = arith.constant 0 : i32
    %c0_i32_0 = arith.constant 0 : i32
    %c0_i32_1 = arith.constant 0 : i32
    return %c0_i32, %c0_i32_0 : i32, i32
  }
  func.func @transform_5(%arg0: i32) -> (i32, i32, i32) {
    %c0_i32 = arith.constant 0 : i32
    %c0_i32_0 = arith.constant 0 : i32
    %c0_i32_1 = arith.constant 0 : i32
    return %arg0, %c0_i32, %c0_i32_0 : i32, i32, i32
  }
}

</mosaic_0001>

<bundles_post_ra>
// kernel: up_conv_forward.1
= control target key start
LH: loop header
LB: loop body
LE: loop exit
PB: predicated region body
PF: predicated region fallthrough
CT: control target
= control target key end

     0   :  { %s1656_s18 = smov 0   ;;  %s2165_s0 = inlined_call_operand.vmem [shape: bf16[2,10,10,16], index: 0, kind: input, shape index: {}]   ;;  %s2166_s1 = inlined_call_operand.vmem [shape: bf16[144,128], index: 1, kind: input, shape index: {}]   ;;  %s2167_s2 = inlined_call_operand.vmem [shape: f32[1,128], index: 2, kind: input, shape index: {}]   ;;  %s2168_s3 = inlined_call_operand.vmem [shape: f32[1,32], index: 3, kind: input, shape index: {}]   ;;  %s2169_s4 = inlined_call_operand.vmem [shape: f32[1,32], index: 4, kind: input, shape index: {}]   ;;  %s2170_s5 = inlined_call_operand.vmem [shape: f32[2,64,128], index: 5, kind: output, shape index: {}]  }
   0x1 LB: > { %s1419_s19 = sadd.s32 4294967295, %s1616_s18   ;;  %p1423_p0 = scmp.ge.s32.totalorder %s1616_s18, 1  ;;  %s1616_s18 = sphi %s1656_s18, %s15_s18  }
   0x2   : > { %p187_p1 = scmp.lt.s32.totalorder %s1616_s18, 3 }
   0x4   : > { %p188_p2 = pnand %p1423_p0, %p187_p1 }
   0x5   : > { %p215_p3 = scmp.lt.s32.totalorder (!%p188_p2), %s1419_s19, 1  ;;  %v1595_v0 = vld [vmem:[%s2166_s1] sm:$0xff] (!%p188_p2)   ;;  %v1618_v1 = vmov (!%p188_p2), 0   ;;  %vm381_vm0 = vcmask (!%p188_p2), 1042432   ;;  %v1596_v2 = vld [vmem:[%s2166_s1 + $0x8] sm:$0xff] (!%p188_p2)   ;;  %vm382_vm1 = vcmask (!%p188_p2), 1046532  }
   0x6   : > { %191 = sbr.rel (%p188_p2) target bundleno = 991 (0x3df), region = 40  ;;  %1136 = vmatprep.subr.bf16.mxu0 (!%p188_p2), %v1618_v1  ;;  %1552 = vmatprep.subr.bf16.mxu1 (!%p188_p2), %v1618_v1  ;;  %v1597_v3 = vld [vmem:[%s2166_s1 + $0x10] sm:$0xff] (!%p188_p2)   ;;  %v1598_v16 = vld [vmem:[%s2166_s1 + $0x18] sm:$0xff] (!%p188_p2)   ;;  %s1619_s7 = smov (!%p188_p2), 48   ;;  %vm1704_vm2 = vmor (!%p188_p2), %vm381_vm0, %vm382_vm1  ;;  %vm242_vm3 = vsmask.f32 (!%p188_p2), 3328 }
   0x7   : > { %1137 = vmatpush1.bf16.msra.mxu0 (!%p188_p2), %v1595_v0  ;;  %1561 = vmatpush1.bf16.msra.mxu1 (!%p188_p2), %v1595_v0  ;;  %vm243_vm4 = vsmask.f32 (!%p188_p2), 7440  ;;  %v1599_v49 = vld [vmem:[%s2166_s1 + $0x20] sm:$0xff] (!%p188_p2)   ;;  %s1620_s10 = smov (!%p188_p2), 32   ;;  %s1621_s11 = smov (!%p188_p2), 96   ;;  %vm974_vm6 = vcmask (!%p188_p2), 130048  }
   0x8   : > { %1138 = vmatprep.subr.bf16.mxu0 (!%p188_p2), %v1618_v1  ;;  %1553 = vmatprep.subr.bf16.mxu1 (!%p188_p2), %v1618_v1  ;;  %s1622_s14 = smov (!%p188_p2), 80   ;;  %vm1790_vm5 = vmor (!%p188_p2), %vm242_vm3, %vm243_vm4  ;;  %s1623_s23 = smov (!%p188_p2), 64   ;;  %vm987_vm7 = vcmask (!%p188_p2), 261120   ;;  %vm996_vm8 = vcmask (!%p188_p2), 392192   ;;  %vm1005_vm9 = vcmask (!%p188_p2), 523264   ;;  %vm1014_vm10 = vcmask (!%p188_p2), 654336  }
   0x9   : > { %s1624_s24 = smov (!%p188_p2), 16   ;;  %s1625_s25 = smov (!%p188_p2), 112   ;;  %vm1023_vm11 = vcmask (!%p188_p2), 785408   ;;  %vm1032_vm12 = vcmask (!%p188_p2), 916480  }
   0xb   : > { %1139 = vmatpush1.bf16.msra.mxu0 (!%p188_p2), %v1596_v2  ;;  %1562 = vmatpush1.bf16.msra.mxu1 (!%p188_p2), %v1596_v2 }
   0xc   : > { %1140 = vmatprep.subr.bf16.mxu0 (!%p188_p2), %v1618_v1  ;;  %1554 = vmatprep.subr.bf16.mxu1 (!%p188_p2), %v1618_v1 }
   0xd   : > { %s2176_s19 = smov (!%p215_p3, %s1419_s19), 1 }
   0xe   : > { %s1570_s22 = smul.u32 80, %s2176_s19 }
   0xf   : > { %1141 = vmatpush1.bf16.msra.mxu0 %v1597_v3  ;;  %1563 = vmatpush1.bf16.msra.mxu1 %v1597_v3 }
  0x10   : > { %s1683_s29 = scalar_lea.vmem %s2165_s0, %s1570_s22  ;;  %1142 = vmatprep.subr.bf16.mxu0 %v1618_v1  ;;  %1555 = vmatprep.subr.bf16.mxu1 %v1618_v1 }
  0x11   : > { %v1435_v4 = vld [vmem:[%s1683_s29 + $0x8] sm:$0xf]  ;;  %v1436_v5 = vld [vmem:[%s1683_s29 + $0x10] sm:$0xf]  ;;  %v1688_v6 = vld [vmem:[%s1683_s29 + $0x4] sm:$0x1] }
  0x12   : > { %v448_v7 = vshrl.u32 %v1436_v5, 16  ;;  %v451_v8 = vshll.u32 %v1436_v5, 16  ;;  %v1511_v9 = vcombine.low %v1435_v4, %v1436_v5  ;;  %v434_v10 = vshrl.u32 %v1435_v4, 16  ;;  %v1691_v11 = vld [vmem:[%s1683_s29 + $0xc] sm:$0x1] }
  0x13   : > { %v437_v12 = vshll.u32 %v1435_v4, 16  ;;  %v269_v13 = vshll.u32 %v1691_v11, 16  ;;  %v357_v14 = vld [vmem:[%s1683_s29] sm:$0xe]  ;;  %v358_v15 = vld [vmem:[%s1683_s29 + $0x8] sm:$0xe]  ;;  %1143 = vmatpush1.bf16.msra.mxu0 %v1598_v16  ;;  %1564 = vmatpush1.bf16.msra.mxu1 %v1598_v16 }
  0x14   : > { %v450_v17 = vrot.slane %v448_v7, 4  ;;  %v453_v18 = vrot.slane %v451_v8, 5  ;;  %866 = vrot.lane.b32.xlu1 %v1511_v9, %s1619_s7  ;;  %v436_v19 = vrot.slane %v434_v10, 4  ;;  %v1427_v21 = vrot.slane %v357_v14, 9  ;;  %v1467_v22 = vld [vmem:[%s1683_s29 + $0x10] sm:$0xf]  ;;  %1144 = vmatprep.subr.bf16.mxu0 %v1618_v1 }
  0x15   : > { %v439_v23 = vrot.slane %v437_v12, 5  ;;  %v386_v24 = vrot.slane %v1688_v6, 5  ;;  %v1428_v25 = vrot.slane %v358_v15, 9  ;;  %v390_v26 = vrot.slane %v1691_v11, 5  ;;  %v1468_v27 = vld [vmem:[%s1683_s29 + $0x18] sm:$0xf]  ;;  %1556 = vmatprep.subr.bf16.mxu1 %v1618_v1 }
  0x16   : > { %v454_v28 = vor.u32 %v453_v18, %v450_v17  ;;  %v255_v29 = vshll.u32 %v1688_v6, 16  ;;  %v619_v30 = vshrl.u32 %v1467_v22, 16  ;;  %v622_v31 = vshll.u32 %v1467_v22, 16  ;;  %v1714_v32 = vld [vmem:[%s1683_s29 + $0xc] sm:$0x1] }
  0x17   : > { %v440_v33 = vor.u32 %v439_v23, %v436_v19  ;;  %v387_v34 = vsel %vm1704_vm2, %v1427_v21, %v386_v24  ;;  %v391_v35 = vsel %vm1704_vm2, %v1428_v25, %v390_v26  ;;  %v633_v36 = vshrl.u32 %v1468_v27, 16  ;;  %v1723_v37 = vld [vmem:[%s1683_s29 + $0x14] sm:$0x1]  ;;  %v1451_v38 = vld [vmem:[%s1683_s29 + $0x8] sm:$0xe]  ;;  %1145 = vmatpush1.bf16.msra.mxu0 %v1599_v49  ;;  %1565 = vmatpush1.bf16.msra.mxu1 %v1599_v49 }
  0x18   : > { %v1726_v39 = vrot.slane %v454_v28, 4  ;;  %v1507_v40 = vcombine.low %v387_v34, %v391_v35  ;;  %v621_v41 = vrot.slane %v619_v30, 4  ;;  %v624_v42 = vrot.slane %v622_v31, 5  ;;  %v1452_v43 = vld [vmem:[%s1683_s29 + $0x10] sm:$0xe]  ;;  %v1600_v7 = vld [vmem:[%s2166_s1 + $0x28] sm:$0xff]   ;;  %1146 = vmatprep.subr.bf16.mxu0 %v1618_v1  ;;  %1557 = vmatprep.subr.bf16.mxu1 %v1618_v1 }
  0x19   : > { %v1729_v44 = vrot.slane %v440_v33, 4  ;;  %v1731_v45 = vrot.slane %v633_v36, 4  ;;  %v636_v46 = vshll.u32 %v1468_v27, 16  ;;  %v1523_v47 = vcombine.low %v1467_v22, %v1468_v27  ;;  %v1734_v48 = vld [vmem:[%s1683_s29 + $0x14] sm:$0x1] }
  0x1a   : > { %838 = vrot.lane.b32.xlu0 %v1507_v40, %s1620_s10  ;;  %v1459_v50 = vrot.slane %v1451_v38, 9  ;;  %v571_v51 = vrot.slane %v1714_v32, 5  ;;  %v1460_v52 = vrot.slane %v1452_v43, 9  ;;  %v575_v53 = vrot.slane %v1723_v37, 5  ;;  %v1743_v54 = vld [vmem:[%s1683_s29 + $0x1c] sm:$0x1] }
  0x1b   : > { %v638_v55 = vrot.slane %v636_v46, 5  ;;  %934 = vrot.lane.b32.xlu1 %v1523_v47, %s1621_s11  ;;  %v359_v56 = vld [vmem:[%s1683_s29 + $0x10] sm:$0xe]  ;;  %v360_v57 = vld [vmem:[%s1683_s29 + $0x18] sm:$0xe]  ;;  %v394_v58 = vrot.slane %v1734_v48, 5  ;;  %v625_v59 = vor.u32 %v624_v42, %v621_v41  ;;  %1147 = vmatpush1.bf16.msra.mxu0 %v1600_v7 }
  0x1c   : > { %v572_v60 = vsel %vm1704_vm2, %v1459_v50, %v571_v51  ;;  %v576_v61 = vsel %vm1704_vm2, %v1460_v52, %v575_v53  ;;  %v1429_v62 = vrot.slane %v359_v56, 9  ;;  %v1430_v63 = vrot.slane %v360_v57, 9  ;;  %v1756_v0 = vld [vmem:[%s1683_s29] sm:$0xf]  ;;  %v1759_v2 = vld [vmem:[%s1683_s29 + $0x8] sm:$0xf]  ;;  %1566 = vmatpush1.bf16.msra.mxu1 %v1600_v7  ;;  %1148 = vmatprep.subr.bf16.mxu0 %v1618_v1 }
  0x1d   : > { %v1519_v3 = vcombine.low %v572_v60, %v576_v61  ;;  %v398_v4 = vrot.slane %v1743_v54, 5  ;;  %v246_v5 = vshrl.u32 %v1756_v0, 16  ;;  %v249_v6 = vshll.u32 %v1756_v0, 16  ;;  %v1772_v14 = vld [vmem:[%s1683_s29 + $0x14] sm:$0x1]  ;;  %1558 = vmatprep.subr.bf16.mxu1 %v1618_v1  ;;  %v1604_v61 = vld [vmem:[%s2166_s1 + $0x40] sm:$0xff]  }
  0x1e   : > { %v395_v8 = vsel %vm1704_vm2, %v1429_v62, %v394_v58  ;;  %v257_v9 = vrot.slane %v255_v29, 5  ;;  %v260_v10 = vshrl.u32 %v1759_v2, 16  ;;  %v263_v12 = vshll.u32 %v1759_v2, 16  ;;  %v1782_v19 = vld [vmem:[%s1683_s29 + $0x1c] sm:$0x1]  ;;  %v1601_v29 = vld [vmem:[%s2166_s1 + $0x30] sm:$0xff]  }
  0x1f   : > { %906 = vrot.lane.b32.xlu0 %v1519_v3, %s1622_s14  ;;  %v399_v15 = vsel %vm1704_vm2, %v1430_v63, %v398_v4  ;;  %v248_v16 = vrot.slane %v246_v5, 4  ;;  %v251_v17 = vrot.slane %v249_v6, 5  ;;  %v271_v18 = vrot.slane %v269_v13, 5  ;;  %v1786_v25 = vld [vmem:[%s1683_s29 + $0x10] sm:$0xf]  ;;  %1149 = vmatpush1.bf16.msra.mxu0 %v1601_v29 }
  0x20   : > { %v1508_v21 = vcombine.low %v395_v8, %v399_v15  ;;  %v262_v22 = vrot.slane %v260_v10, 4  ;;  %v265_v23 = vrot.slane %v263_v12, 5  ;;  %v443_v24 = vshll.u32 %v1714_v32, 16  ;;  %v1809_v43 = vld [vmem:[%s1683_s29 + $0x18] sm:$0xf]  ;;  %1567 = vmatpush1.bf16.msra.mxu1 %v1601_v29  ;;  %1150 = vmatprep.subr.bf16.mxu0 %v1618_v1 }
  0x21   : > { %v252_v27 = vor.u32 %v251_v17, %v248_v16  ;;  %v457_v28 = vshll.u32 %v1723_v37, 16  ;;  %v626_v11 = vrot.slane %v625_v59, 4  ;;  %v628_v13 = vshll.u32 %v1772_v14, 16  ;;  %v1819_v50 = vld [vmem:[%s1683_s29 + $0x20] sm:$0xf]  ;;  %1559 = vmatprep.subr.bf16.mxu1 %v1618_v1 }
  0x22   : > { %840 = vrot.lane.b32.xlu1 %v1508_v21, %s1620_s10  ;;  %v266_v30 = vor.u32 %v265_v23, %v262_v22  ;;  %v445_v31 = vrot.slane %v443_v24, 5  ;;  %v639_v32 = vor.u32 %v638_v55, %v1731_v45  ;;  %v642_v33 = vshll.u32 %v1782_v19, 16  ;;  %v1830_v55 = vld [vmem:[%s1683_s29 + $0x24] sm:$0x1]  ;;  %v1837_v60 = vld [vmem:[%s1683_s29 + $0x28] sm:$0xf] }
  0x23   : > { %v253_v34 = vrot.slane %v252_v27, 4  ;;  %v459_v35 = vrot.slane %v457_v28, 5  ;;  %v630_v36 = vrot.slane %v628_v13, 5  ;;  %v274_v37 = vshrl.u32 %v1786_v25, 16  ;;  %v1846_v4 = vld [vmem:[%s1683_s29 + $0x2c] sm:$0x1] }
  0x24   : > { %v267_v38 = vrot.slane %v266_v30, 4  ;;  %v446_v40 = vsel %vm1790_vm5, %v1729_v44, %v445_v31  ;;  %v640_v41 = vrot.slane %v639_v32, 4  ;;  %v644_v42 = vrot.slane %v642_v33, 5  ;;  %v1603_v44 = vld [vmem:[%s2166_s1 + $0x38] sm:$0xff]   ;;  %v1438_v27 = vld [vmem:[%s1683_s29 + $0x20] sm:$0xf] }
  0x25   : > { %v258_v45 = vsel %vm1790_vm5, %v253_v34, %v257_v9  ;;  %v460_v46 = vsel %vm1790_vm5, %v1726_v39, %v459_v35  ;;  %v631_v47 = vsel %vm1790_vm5, %v626_v11, %v630_v36  ;;  %v276_v49 = vrot.slane %v274_v37, 4  ;;  %v1853_v9 = vld [vmem:[%s1683_s29 + $0x18] sm:$0xf]  ;;  %1151 = vmatpush1.bf16.msra.mxu0 %v1603_v44  ;;  %1568 = vmatpush1.bf16.msra.mxu1 %v1603_v44  ;;  %v361_v31 = vld [vmem:[%s1683_s29 + $0x20] sm:$0xe] }
  0x26   : > { %v272_v51 = vsel %vm1790_vm5, %v267_v38, %v271_v18  ;;  %v1515_v52 = vcombine.low %v446_v40, %v460_v46  ;;  %v645_v39 = vsel %vm1790_vm5, %v640_v41, %v644_v42  ;;  %v277_v53 = vshll.u32 %v1786_v25, 16  ;;  %1152 = vmatprep.subr.bf16.mxu0 %v1618_v1  ;;  %1560 = vmatprep.subr.bf16.mxu1 %v1618_v1  ;;  %v362_v40 = vld [vmem:[%s1683_s29 + $0x28] sm:$0xe] }
  0x27   : > { %v1503_v56 = vcombine.low %v258_v45, %v272_v51  ;;  %v1527_v57 = vcombine.low %v631_v47, %v645_v39  ;;  %v283_v58 = vshll.u32 %v1734_v48, 16  ;;  %v288_v59 = vshrl.u32 %v1809_v43, 16  ;;  %v1445_v47 = vld [vmem:[%s1683_s29 + $0x1c] sm:$0x1] }
  0x28   : > { %886 = vrot.lane.b32.xlu1 %v1515_v52, %s1623_s23  ;;  %v279_v62 = vrot.slane %v277_v53, 5  ;;  %v291_v63 = vshll.u32 %v1809_v43, 16  ;;  %v297_v3 = vshll.u32 %v1743_v54, 16  ;;  %v302_v48 = vshrl.u32 %v1819_v50, 16 }
  0x29   : > { %818 = vrot.lane.b32.xlu0 %v1503_v56, %s1624_s24  ;;  %v285_v5 = vrot.slane %v283_v58, 5  ;;  %v290_v6 = vrot.slane %v288_v59, 4  ;;  %v305_v7 = vshll.u32 %v1819_v50, 16  ;;  %v311_v8 = vshll.u32 %v1830_v55, 16  ;;  %1153 = vmatpush1.bf16.msra.mxu0 %v1604_v61 }
  0x2a   : > { %v280_v10 = vor.u32 %v279_v62, %v276_v49  ;;  %v293_v12 = vrot.slane %v291_v63, 5  ;;  %v299_v54 = vrot.slane %v297_v3, 5  ;;  %v304_v15 = vrot.slane %v302_v48, 4  ;;  %1569 = vmatpush1.bf16.msra.mxu1 %v1604_v61  ;;  %v1446_v49 = vld [vmem:[%s1683_s29 + $0x24] sm:$0x1] }
  0x2b   : > { %v307_v16 = vrot.slane %v305_v7, 5  ;;  %v313_v17 = vrot.slane %v311_v8, 5  ;;  %v316_v18 = vshrl.u32 %v1837_v60, 16  ;;  %v319_v21 = vshll.u32 %v1837_v60, 16  ;;  %v1439_v3 = vld [vmem:[%s1683_s29 + $0x28] sm:$0xf] }
  0x2c   : > { %v281_v22 = vrot.slane %v280_v10, 4  ;;  %v294_v23 = vor.u32 %v293_v12, %v290_v6  ;;  %v325_v24 = vshll.u32 %v1846_v4, 16  ;;  %v462_v28 = vshrl.u32 %v1853_v9, 16  ;;  %v1440_v48 = vld [vmem:[%s1683_s29 + $0x30] sm:$0xf] }
  0x2d   : > { %954 = vrot.lane.b32.xlu0 %v1527_v57, %s1625_s25  ;;  %v308_v11 = vor.u32 %v307_v16, %v304_v15  ;;  %v318_v13 = vrot.slane %v316_v18, 4  ;;  %v321_v29 = vrot.slane %v319_v21, 5  ;;  %v465_v30 = vshll.u32 %v1853_v9, 16  ;;  %v1454_v18 = vld [vmem:[%s1683_s29 + $0x20] sm:$0xe] }
  0x2e   : > { %v286_v1 = vsel %vm1790_vm5, %v281_v22, %v285_v5  ;;  %v295_v32 = vrot.slane %v294_v23, 4  ;;  %v327_v33 = vrot.slane %v325_v24, 5  ;;  %v464_v34 = vrot.slane %v462_v28, 4  ;;  %v1448_v28 = vld [vmem:[%s1683_s29 + $0x34] sm:$0x1] }
  0x2f   : > { %v309_v35 = vrot.slane %v308_v11, 4  ;;  %v322_v36 = vor.u32 %v321_v29, %v318_v13  ;;  %v467_v37 = vrot.slane %v465_v30, 5  ;;  %v476_v38 = vshrl.u32 %v1438_v27, 16 }
  0x30   : > { %v300_v41 = vsel %vm1790_vm5, %v295_v32, %v299_v54  ;;  %v479_v42 = vshll.u32 %v1438_v27, 16  ;;  %v1512_v45 = vcombine.low %v1853_v9, %v1438_v27  ;;  %v1431_v46 = vrot.slane %v361_v31, 9  ;;  %v1447_v27 = vld [vmem:[%s1683_s29 + $0x2c] sm:$0x1]  ;;  %v1469_v31 = vld [vmem:[%s1683_s29 + $0x20] sm:$0xf] }
  0x31   : > { %v1504_v44 = vcombine.low %v286_v1, %v300_v41  ;;  %v314_v51 = vsel %vm1790_vm5, %v309_v35, %v313_v17  ;;  %v323_v52 = vrot.slane %v322_v36, 4  ;;  %v478_v39 = vrot.slane %v476_v38, 4 }
  0x32   : > { %v481_v53 = vrot.slane %v479_v42, 5  ;;  %v402_v56 = vrot.slane %v1830_v55, 5  ;;  %v1432_v57 = vrot.slane %v362_v40, 9  ;;  %v406_v58 = vrot.slane %v1846_v4, 5  ;;  %v1453_v4 = vld [vmem:[%s1683_s29 + $0x18] sm:$0xe] }
  0x33   : > { %820 = vrot.lane.b32.xlu1 %v1504_v44, %s1624_s24  ;;  %v328_v59 = vsel %vm1790_vm5, %v323_v52, %v327_v33  ;;  %v468_v61 = vor.u32 %v467_v37, %v464_v34  ;;  %v471_v62 = vshll.u32 %v1445_v47, 16  ;;  %v485_v63 = vshll.u32 %v1446_v49, 16  ;;  %v1470_v42 = vld [vmem:[%s1683_s29 + $0x28] sm:$0xf] }
  0x34   : > { %v1505_v5 = vcombine.low %v314_v51, %v328_v59  ;;  %v403_v6 = vsel %vm1704_vm2, %v1431_v46, %v402_v56  ;;  %v407_v55 = vsel %vm1704_vm2, %v1432_v57, %v406_v58  ;;  %v482_v7 = vor.u32 %v481_v53, %v478_v39  ;;  %v1455_v44 = vld [vmem:[%s1683_s29 + $0x28] sm:$0xe]  ;;  %v1456_v39 = vld [vmem:[%s1683_s29 + $0x30] sm:$0xe] }
  0x35   : > { %v1509_v8 = vcombine.low %v403_v6, %v407_v55  ;;  %v469_v9 = vrot.slane %v468_v61, 4  ;;  %v473_v10 = vrot.slane %v471_v62, 5  ;;  %v487_v12 = vrot.slane %v485_v63, 5 }
  0x36   : > { %822 = vrot.lane.b32.xlu0 %v1505_v5, %s1624_s24  ;;  %v483_v54 = vrot.slane %v482_v7, 4  ;;  %v490_v15 = vshrl.u32 %v1439_v3, 16  ;;  %v493_v16 = vshll.u32 %v1439_v3, 16  ;;  %v504_v17 = vshrl.u32 %v1440_v48, 16 }
  0x37   : > { %868 = vrot.lane.b32.xlu1 %v1512_v45, %s1619_s7  ;;  %v474_v21 = vsel %vm1790_vm5, %v469_v9, %v473_v10  ;;  %v507_v22 = vshll.u32 %v1440_v48, 16  ;;  %v1513_v23 = vcombine.low %v1439_v3, %v1440_v48  ;;  %v1461_v24 = vrot.slane %v1453_v4, 9  ;;  %v1910_v3 = vld [vmem:[%s1683_s29 + $0x24] sm:$0x1]  ;;  %v1913_v48 = vld [vmem:[%s1683_s29 + $0x2c] sm:$0x1] }
  0x38   : > { %v488_v11 = vsel %vm1790_vm5, %v483_v54, %v487_v12  ;;  %v492_v13 = vrot.slane %v490_v15, 4  ;;  %v495_v29 = vrot.slane %v493_v16, 5  ;;  %v506_v30 = vrot.slane %v504_v17, 4  ;;  %v1471_v4 = vld [vmem:[%s1683_s29 + $0x30] sm:$0xf] }
  0x39   : > { %v1516_v1 = vcombine.low %v474_v21, %v488_v11  ;;  %v509_v32 = vrot.slane %v507_v22, 5  ;;  %v579_v33 = vrot.slane %v1445_v47, 5  ;;  %v1462_v34 = vrot.slane %v1454_v18, 9  ;;  %v1921_v15 = vld [vmem:[%s1683_s29 + $0x34] sm:$0x1] }
  0x3a   : > { %842 = vrot.lane.b32.xlu0 %v1509_v8, %s1620_s10  ;;  %v583_v35 = vrot.slane %v1446_v49, 5  ;;  %v496_v36 = vor.u32 %v495_v29, %v492_v13  ;;  %v499_v37 = vshll.u32 %v1447_v27, 16  ;;  %v513_v38 = vshll.u32 %v1448_v28, 16  ;;  %v1472_v8 = vld [vmem:[%s1683_s29 + $0x38] sm:$0xf] }
  0x3b   : > { %888 = vrot.lane.b32.xlu1 %v1516_v1, %s1623_s23  ;;  %v580_v40 = vsel %vm1704_vm2, %v1461_v24, %v579_v33  ;;  %v510_v41 = vor.u32 %v509_v32, %v506_v30  ;;  %v647_v45 = vshrl.u32 %v1469_v31, 16  ;;  %v650_v46 = vshll.u32 %v1469_v31, 16  ;;  %v1931_v24 = vld [vmem:[%s1683_s29 + $0x3c] sm:$0x1] }
  0x3c   : > { %v584_v47 = vsel %vm1704_vm2, %v1462_v34, %v583_v35  ;;  %v497_v51 = vrot.slane %v496_v36, 4  ;;  %v501_v49 = vrot.slane %v499_v37, 5  ;;  %v515_v52 = vrot.slane %v513_v38, 5  ;;  %v1938_v36 = vld [vmem:[%s1683_s29 + $0x30] sm:$0xf] }
  0x3d   : > { %v1520_v53 = vcombine.low %v580_v40, %v584_v47  ;;  %v511_v56 = vrot.slane %v510_v41, 4  ;;  %v649_v57 = vrot.slane %v647_v45, 4  ;;  %v652_v58 = vrot.slane %v650_v46, 5  ;;  %v240_v37 = vld [vmem:[%s1683_s29 + $0x34] sm:$0x1] }
  0x3e   : > { %870 = vrot.lane.b32.xlu0 %v1513_v23, %s1619_s7  ;;  %v502_v59 = vsel %vm1790_vm5, %v497_v51, %v501_v49  ;;  %v661_v61 = vshrl.u32 %v1470_v42, 16  ;;  %v664_v62 = vshll.u32 %v1470_v42, 16  ;;  %v1524_v63 = vcombine.low %v1469_v31, %v1470_v42  ;;  %v1945_v45 = vld [vmem:[%s1683_s29 + $0x38] sm:$0xf] }
  0x3f   : > { %908 = vrot.lane.b32.xlu1 %v1520_v53, %s1622_s14  ;;  %v516_v5 = vsel %vm1790_vm5, %v511_v56, %v515_v52  ;;  %v1463_v6 = vrot.slane %v1455_v44, 9  ;;  %v587_v55 = vrot.slane %v1447_v27, 5  ;;  %v1464_v7 = vrot.slane %v1456_v39, 9  ;;  %v241_v52 = vld [vmem:[%s1683_s29 + $0x3c] sm:$0x1] }
  0x40   : > { %v1517_v9 = vcombine.low %v502_v59, %v516_v5  ;;  %v663_v10 = vrot.slane %v661_v61, 4  ;;  %v666_v12 = vrot.slane %v664_v62, 5  ;;  %v591_v54 = vrot.slane %v1448_v28, 5  ;;  %v363_v62 = vld [vmem:[%s1683_s29 + $0x30] sm:$0xe] }
  0x41   : > { %v588_v16 = vsel %vm1704_vm2, %v1463_v6, %v587_v55  ;;  %v653_v17 = vor.u32 %v652_v58, %v649_v57  ;;  %v656_v18 = vshll.u32 %v1910_v3, 16  ;;  %v670_v21 = vshll.u32 %v1913_v48, 16 }
  0x42   : > { %890 = vrot.lane.b32.xlu0 %v1517_v9, %s1623_s23  ;;  %v592_v22 = vsel %vm1704_vm2, %v1464_v7, %v591_v54  ;;  %v667_v23 = vor.u32 %v666_v12, %v663_v10  ;;  %v675_v30 = vshrl.u32 %v1471_v4, 16  ;;  %v678_v31 = vshll.u32 %v1471_v4, 16  ;;  %v364_v7 = vld [vmem:[%s1683_s29 + $0x38] sm:$0xe] }
  0x43   : > { %936 = vrot.lane.b32.xlu1 %v1524_v63, %s1621_s11  ;;  %v1521_v27 = vcombine.low %v588_v16, %v592_v22  ;;  %v654_v28 = vrot.slane %v653_v17, 4  ;;  %v658_v11 = vrot.slane %v656_v18, 5  ;;  %v672_v13 = vrot.slane %v670_v21, 5  ;;  %v1441_v18 = vld [vmem:[%s1683_s29 + $0x38] sm:$0xf] }
  0x44   : > { %v668_v29 = vrot.slane %v667_v23, 4  ;;  %v689_v1 = vshrl.u32 %v1472_v8, 16  ;;  %v692_v33 = vshll.u32 %v1472_v8, 16  ;;  %v1525_v34 = vcombine.low %v1471_v4, %v1472_v8  ;;  %v1442_v21 = vld [vmem:[%s1683_s29 + $0x40] sm:$0xf] }
  0x45   : > { %v659_v32 = vsel %vm1790_vm5, %v654_v28, %v658_v11  ;;  %v684_v35 = vshll.u32 %v1921_v15, 16  ;;  %v677_v40 = vrot.slane %v675_v30, 4  ;;  %v680_v41 = vrot.slane %v678_v31, 5 }
  0x46   : > { %910 = vrot.lane.b32.xlu0 %v1521_v27, %s1622_s14  ;;  %v673_v38 = vsel %vm1790_vm5, %v668_v29, %v672_v13  ;;  %v691_v42 = vrot.slane %v689_v1, 4  ;;  %v694_v44 = vrot.slane %v692_v33, 5  ;;  %v698_v51 = vshll.u32 %v1931_v24, 16 }
  0x47   : > { %v1528_v46 = vcombine.low %v659_v32, %v673_v38  ;;  %v686_v47 = vrot.slane %v684_v35, 5  ;;  %v681_v49 = vor.u32 %v680_v41, %v677_v40  ;;  %v330_v39 = vshrl.u32 %v1938_v36, 16  ;;  %v1450_v41 = vld [vmem:[%s1683_s29 + $0x44] sm:$0x1] }
  0x48   : > { %v333_v53 = vshll.u32 %v1938_v36, 16  ;;  %v339_v56 = vshll.u32 %v240_v37, 16  ;;  %v695_v57 = vor.u32 %v694_v44, %v691_v42  ;;  %v700_v58 = vrot.slane %v698_v51, 5  ;;  %v1457_v42 = vld [vmem:[%s1683_s29 + $0x38] sm:$0xe] }
  0x49   : > { %956 = vrot.lane.b32.xlu1 %v1528_v46, %s1625_s25  ;;  %v344_v59 = vshrl.u32 %v1945_v45, 16  ;;  %v347_v61 = vshll.u32 %v1945_v45, 16  ;;  %v682_v63 = vrot.slane %v681_v49, 4  ;;  %v332_v5 = vrot.slane %v330_v39, 4  ;;  %v1458_v49 = vld [vmem:[%s1683_s29 + $0x40] sm:$0xe] }
  0x4a   : > { %938 = vrot.lane.b32.xlu0 %v1525_v34, %s1621_s11  ;;  %v335_v6 = vrot.slane %v333_v53, 5  ;;  %v341_v55 = vrot.slane %v339_v56, 5  ;;  %v696_v4 = vrot.slane %v695_v57, 4  ;;  %v353_v10 = vshll.u32 %v241_v52, 16  ;;  %v1449_v34 = vld [vmem:[%s1683_s29 + $0x3c] sm:$0x1] }
  0x4b   : > { %v346_v8 = vrot.slane %v344_v59, 4  ;;  %v349_v9 = vrot.slane %v347_v61, 5  ;;  %v687_v12 = vsel %vm1790_vm5, %v682_v63, %v686_v47  ;;  %v1433_v16 = vrot.slane %v363_v62, 9  ;;  %v1473_v57 = vld [vmem:[%s1683_s29 + $0x40] sm:$0xf] }
  0x4c   : > { %v336_v54 = vor.u32 %v335_v6, %v332_v5  ;;  %v410_v17 = vrot.slane %v240_v37, 5  ;;  %v701_v22 = vsel %vm1790_vm5, %v696_v4, %v700_v58  ;;  %v355_v27 = vrot.slane %v353_v10, 5  ;;  %v1474_v63 = vld [vmem:[%s1683_s29 + $0x48] sm:$0xf] }
  0x4d   : > { %v350_v23 = vor.u32 %v349_v9, %v346_v8  ;;  %v1434_v28 = vrot.slane %v364_v7, 9  ;;  %v1529_v11 = vcombine.low %v687_v12, %v701_v22  ;;  %v414_v30 = vrot.slane %v241_v52, 5  ;;  %v1983_v12 = vld [vmem:[%s1683_s29 + $0x44] sm:$0x1] }
  0x4e   : > { %v337_v13 = vrot.slane %v336_v54, 4  ;;  %v411_v29 = vsel %vm1704_vm2, %v1433_v16, %v410_v17  ;;  %v518_v1 = vshrl.u32 %v1441_v18, 16  ;;  %v521_v32 = vshll.u32 %v1441_v18, 16 }
  0x4f   : > { %v351_v31 = vrot.slane %v350_v23, 4  ;;  %v532_v33 = vshrl.u32 %v1442_v21, 16  ;;  %958 = vrot.lane.b32.xlu0 %v1529_v11, %s1625_s25  ;;  %v415_v37 = vsel %vm1704_vm2, %v1434_v28, %v414_v30  ;;  %v535_v38 = vshll.u32 %v1442_v21, 16 }
  0x50   : > { %v342_v35 = vsel %vm1790_vm5, %v337_v13, %v341_v55  ;;  %v1514_v40 = vcombine.low %v1441_v18, %v1442_v21  ;;  %v1510_v44 = vcombine.low %v411_v29, %v415_v37  ;;  %v520_v47 = vrot.slane %v518_v1, 4  ;;  %v1988_v21 = vld [vmem:[%s1683_s29 + $0x4c] sm:$0x1] }
  0x51   : > { %v356_v46 = vsel %vm1790_vm5, %v351_v31, %v355_v27  ;;  %v523_v51 = vrot.slane %v521_v32, 5  ;;  %v534_v39 = vrot.slane %v532_v33, 4  ;;  %v537_v53 = vrot.slane %v535_v38, 5 }
  0x52   : > { %v1506_v52 = vcombine.low %v342_v35, %v356_v46  ;;  %v527_v56 = vshll.u32 %v1449_v34, 16  ;;  %v541_v59 = vshll.u32 %v1450_v41, 16  ;;  %v1465_v61 = vrot.slane %v1457_v42, 9  ;;  %v1483_v35 = vld [vmem:[%s1683_s29 + $0x10] sm:$0xe] }
  0x53   : > { %v524_v58 = vor.u32 %v523_v51, %v520_v47  ;;  %v595_v62 = vrot.slane %v1449_v34, 5  ;;  %844 = vrot.lane.b32.xlu0 %v1510_v44, %s1620_s10  ;;  %v538_v6 = vor.u32 %v537_v53, %v534_v39  ;;  %v1466_v55 = vrot.slane %v1458_v49, 9  ;;  %v1484_v42 = vld [vmem:[%s1683_s29 + $0x18] sm:$0xe]  ;;  %v1485_v51 = vld [vmem:[%s1683_s29 + $0x20] sm:$0xe] }
  0x54   : > { %824 = vrot.lane.b32.xlu1 %v1506_v52, %s1624_s24  ;;  %v529_v5 = vrot.slane %v527_v56, 5  ;;  %v599_v7 = vrot.slane %v1450_v41, 5  ;;  %v543_v8 = vrot.slane %v541_v59, 5  ;;  %v703_v10 = vshrl.u32 %v1473_v57, 16  ;;  %v1486_v56 = vld [vmem:[%s1683_s29 + $0x28] sm:$0xe] }
  0x55   : > { %v525_v4 = vrot.slane %v524_v58, 4  ;;  %v596_v9 = vsel %vm1704_vm2, %v1465_v61, %v595_v62  ;;  %v539_v54 = vrot.slane %v538_v6, 4  ;;  %v706_v17 = vshll.u32 %v1473_v57, 16  ;;  %v1487_v59 = vld [vmem:[%s1683_s29 + $0x30] sm:$0xe] }
  0x56   : > { %v600_v16 = vsel %vm1704_vm2, %v1466_v55, %v599_v7  ;;  %v717_v18 = vshrl.u32 %v1474_v63, 16  ;;  %v705_v23 = vrot.slane %v703_v10, 4  ;;  %v720_v27 = vshll.u32 %v1474_v63, 16  ;;  %v1489_v7 = vld [vmem:[%s1683_s29 + $0x40] sm:$0xe] }
  0x57   : > { %v530_v22 = vsel %vm1790_vm5, %v525_v4, %v529_v5  ;;  %v544_v28 = vsel %vm1790_vm5, %v539_v54, %v543_v8  ;;  %v1522_v11 = vcombine.low %v596_v9, %v600_v16  ;;  %v708_v13 = vrot.slane %v706_v17, 5  ;;  %v1488_v5 = vld [vmem:[%s1683_s29 + $0x38] sm:$0xe]  ;;  %v1490_v4 = vld [vmem:[%s1683_s29 + $0x48] sm:$0xe] }
  0x58   : > { %872 = vrot.lane.b32.xlu1 %v1514_v40, %s1619_s7  ;;  %v719_v29 = vrot.slane %v717_v18, 4  ;;  %v1518_v30 = vcombine.low %v530_v22, %v544_v28  ;;  %v722_v31 = vrot.slane %v720_v27, 5  ;;  %v712_v1 = vshll.u32 %v1983_v12, 16  ;;  %s1551_s7 = sshll.u32 %s2176_s19, 6 }
  0x59   : > { %v726_v32 = vshll.u32 %v1988_v21, 16  ;;  %v709_v33 = vor.u32 %v708_v13, %v705_v23  ;;  %v1499_v34 = vcombine.low %v1756_v0, %v1759_v2  ;;  %v1526_v37 = vcombine.low %v1473_v57, %v1474_v63 }
  0x5a   : > { %892 = vrot.lane.b32.xlu0 %v1518_v30, %s1623_s23  ;;  %v714_v38 = vrot.slane %v712_v1, 5  ;;  %v723_v40 = vor.u32 %v722_v31, %v719_v29  ;;  %v764_v46 = vrot.slane %v1910_v3, 5  ;;  %v768_v44 = vrot.slane %v1913_v48, 5 }
  0x5b   : > { %v728_v41 = vrot.slane %v726_v32, 5  ;;  %v710_v47 = vrot.slane %v709_v33, 4  ;;  %v780_v52 = vrot.slane %v1983_v12, 5  ;;  %v1500_v39 = vcombine.low %v1786_v25, %v1809_v43 }
  0x5c   : > { %912 = vrot.lane.b32.xlu1 %v1522_v11, %s1622_s14  ;;  %v724_v49 = vrot.slane %v723_v40, 4  ;;  %v1491_v53 = vrot.slane %v1483_v35, 9  ;;  %v756_v3 = vrot.slane %v1772_v14, 5  ;;  %v1492_v48 = vrot.slane %v1484_v42, 9 }
  0x5d   : > { %v715_v57 = vsel %vm1790_vm5, %v710_v47, %v714_v38  ;;  %v760_v58 = vrot.slane %v1782_v19, 5  ;;  %v784_v62 = vrot.slane %v1988_v21, 5  ;;  %v1501_v63 = vcombine.low %v1819_v50, %v1837_v60 }
  0x5e   : > { %940 = vrot.lane.b32.xlu0 %v1526_v37, %s1621_s11  ;;  %v729_v61 = vsel %vm1790_vm5, %v724_v49, %v728_v41  ;;  %v757_v14 = vsel %vm1704_vm2, %v1491_v53, %v756_v3  ;;  %v1493_v55 = vrot.slane %v1485_v51, 9  ;;  %v1494_v26 = vrot.slane %v1486_v56, 9 }
  0x5f   : > { %v1530_v6 = vcombine.low %v715_v57, %v729_v61  ;;  %v761_v19 = vsel %vm1704_vm2, %v1492_v48, %v760_v58  ;;  %v1495_v9 = vrot.slane %v1487_v59, 9  ;;  %v772_v10 = vrot.slane %v1921_v15, 5 }
  0x60   : > { %v1531_v8 = vcombine.low %v757_v14, %v761_v19  ;;  %v765_v12 = vsel %vm1704_vm2, %v1493_v55, %v764_v46  ;;  %v1496_v54 = vrot.slane %v1488_v5, 9  ;;  %v776_v16 = vrot.slane %v1931_v24, 5 }
  0x61   : > { %960 = vrot.lane.b32.xlu1 %v1530_v6, %s1625_s25  ;;  %v1502_v17 = vcombine.low %v1938_v36, %v1945_v45  ;;  %v769_v18 = vsel %vm1704_vm2, %v1494_v26, %v768_v44  ;;  %v773_v21 = vsel %vm1704_vm2, %v1495_v9, %v772_v10  ;;  %v1497_v15 = vrot.slane %v1489_v7, 9 }
  0x62   : > { %1545 = vmatprep.mubr.msk.bf16.mxu0 %vm974_vm6, %v1531_v8  ;;  %v1498_v22 = vrot.slane %v1490_v4, 9  ;;  %v1532_v23 = vcombine.low %v765_v12, %v769_v18  ;;  %v777_v27 = vsel %vm1704_vm2, %v1496_v54, %v776_v16 }
  0x63   : > { %v1533_v28 = vcombine.low %v773_v21, %v777_v27  ;;  %v781_v24 = vsel %vm1704_vm2, %v1497_v15, %v780_v52 }
  0x64   : > { %v785_v11 = vsel %vm1704_vm2, %v1498_v22, %v784_v62 }
  0x65   : > { %v1534_v13 = vcombine.low %v781_v24, %v785_v11  ;;  %1547 = vmatprep.mubr.msk.bf16.mxu1 %vm974_vm6, %v1533_v28 }
  0x86   : > { %v867_v29 = vpop.permute.xlu1 %866 }
  0x8c   : > { %v839_v30 = vpop.permute.xlu0 %838 }
  0x8d   : > { %v935_v31 = vpop.permute.xlu1 %934 }
  0x91   : > { %v907_v1 = vpop.permute.xlu0 %906 }
  0x94   : > { %v841_v32 = vpop.permute.xlu1 %840 }
  0x9a   : > { %v887_v37 = vpop.permute.xlu1 %886 }
  0x9b   : > { %v819_v33 = vpop.permute.xlu0 %818 }
  0x9c   : > { %v977_v35 = vsel %vm974_vm6, %v1499_v34, %v819_v33 }
  0x9d   : > { %v989_v20 = vsel %vm987_vm7, %v977_v35, %v839_v30 }
  0x9e   : > { %v998_v38 = vsel %vm996_vm8, %v989_v20, %v867_v29 }
  0x9f   : > { %v1007_v40 = vsel %vm1005_vm9, %v998_v38, %v887_v37  ;;  %v955_v42 = vpop.permute.xlu0 %954 }
  0xa0   : > { %v1016_v41 = vsel %vm1014_vm10, %v1007_v40, %v907_v1 }
  0xa1   : > { %v1025_v46 = vsel %vm1023_vm11, %v1016_v41, %v935_v31  ;;  %v1535_v31 = vld [vmem:[%s2167_s2] ss:$0 sm:$0xff] }
  0xa2   : > { %v1034_v0 = vsel %vm1032_vm12, %v1025_v46, %v955_v42 }
  0xa3   : > { %1169 = vmatmul.mubr.bf16.vlgmr.msra.gmra.mrb[0].mxu0 %v1034_v0 }
  0xa4   : > { %1546 = vmatprep.mubr.msk.bf16.mxu0 %vm974_vm6, %v1532_v23 }
  0xa5   : > { %v821_v2 = vpop.permute.xlu1 %820 }
  0xa6   : > { %v980_v53 = vsel %vm974_vm6, %v1500_v39, %v821_v2 }
  0xa7   : > { %v991_v3 = vsel %vm987_vm7, %v980_v53, %v841_v32 }
  0xa8   : > { %v823_v34 = vpop.permute.xlu0 %822 }
  0xa9   : > { %v869_v44 = vpop.permute.xlu1 %868  ;;  %v983_v25 = vsel %vm974_vm6, %v1501_v63, %v823_v34 }
  0xaa   : > { %v1000_v48 = vsel %vm996_vm8, %v991_v3, %v869_v44 }
  0xac   : > { %v843_v47 = vpop.permute.xlu0 %842 }
  0xad   : > { %v889_v51 = vpop.permute.xlu1 %888  ;;  %v993_v43 = vsel %vm987_vm7, %v983_v25, %v843_v47 }
  0xae   : > { %v1009_v59 = vsel %vm1005_vm9, %v1000_v48, %v889_v51 }
  0xb0   : > { %v871_v49 = vpop.permute.xlu0 %870 }
  0xb1   : > { %v909_v52 = vpop.permute.xlu1 %908  ;;  %v1002_v39 = vsel %vm996_vm8, %v993_v43, %v871_v49 }
  0xb2   : > { %v1018_v61 = vsel %vm1014_vm10, %v1009_v59, %v909_v52 }
  0xb4   : > { %v891_v56 = vpop.permute.xlu0 %890 }
  0xb5   : > { %v937_v57 = vpop.permute.xlu1 %936  ;;  %v1011_v19 = vsel %vm1005_vm9, %v1002_v39, %v891_v56 }
  0xb6   : > { %v1027_v62 = vsel %vm1023_vm11, %v1018_v61, %v937_v57 }
  0xb8   : > { %v911_v58 = vpop.permute.xlu0 %910 }
  0xb9   : > { %v1020_v55 = vsel %vm1014_vm10, %v1011_v19, %v911_v58  ;;  %v1242_v19 = vlaneseq }
  0xbb   : > { %v957_v5 = vpop.permute.xlu1 %956 }
  0xbc   : > { %v1037_v6 = vsel %vm1032_vm12, %v1027_v62, %v957_v5  ;;  %v939_v14 = vpop.permute.xlu0 %938 }
  0xbd   : > { %1177 = vmatmul.mubr.bf16.gmra.mrb[4].mxu0 %v1037_v6  ;;  %v1029_v7 = vsel %vm1023_vm11, %v1020_v55, %v939_v14  ;;  %v1243_v55 = vshrl.u32 %v1242_v19, 7 }
  0xc1   : > { %v959_v4 = vpop.permute.xlu0 %958 }
  0xc2   : > { %v1040_v8 = vsel %vm1032_vm12, %v1029_v7, %v959_v4 }
  0xc3   : > { %1185 = vmatmul.mubr.bf16.vlgmr.msra.gmra.mrb[0].mxu1 %v1040_v8 }
  0xc4   : > { %1548 = vmatprep.mubr.msk.bf16.mxu1 %vm974_vm6, %v1534_v13 }
  0xc5   : > { %v845_v60 = vpop.permute.xlu0 %844 }
  0xc6   : > { %v825_v50 = vpop.permute.xlu1 %824 }
  0xc7   : > { %v986_v63 = vsel %vm974_vm6, %v1502_v17, %v825_v50  ;;  %v2099_v50 = vsub.s32 0, %v1243_v55 }
  0xc8   : > { %v995_v26 = vsel %vm987_vm7, %v986_v63, %v845_v60 }
  0xca   : > { %v873_v9 = vpop.permute.xlu1 %872 }
  0xcb   : > { %v1004_v10 = vsel %vm996_vm8, %v995_v26, %v873_v9 }
  0xcc   : > { %v893_v12 = vpop.permute.xlu0 %892 }
  0xcd   : > { %v1013_v54 = vsel %vm1005_vm9, %v1004_v10, %v893_v12 }
  0xce   : > { %v913_v16 = vpop.permute.xlu1 %912 }
  0xcf   : > { %v1022_v18 = vsel %vm1014_vm10, %v1013_v54, %v913_v16 }
  0xd0   : > { %v941_v21 = vpop.permute.xlu0 %940 }
  0xd1   : > { %v1031_v15 = vsel %vm1023_vm11, %v1022_v18, %v941_v21 }
  0xd3   : > { %v961_v22 = vpop.permute.xlu1 %960 }
  0xd4   : > { %v1043_v23 = vsel %vm1032_vm12, %v1031_v15, %v961_v22 }
  0xd5   : > { %1193 = vmatmul.mubr.bf16.gmra.mrb[4].mxu1 %v1043_v23 }
 0x176   : > { %v1170_v36 = vpop.f32.mrb[0].mxu0 }
 0x177   : > { %v1172_v45 = vpop.f32.mrb[1].mxu0  ;;  %v1171_v35 = vadd.f32 %v1535_v31, %v1170_v36 }
 0x178   : > { %v1173_v17 = vpop.f32.mrb[2].mxu0 }
 0x179   : > { %v1175_v27 = vpop.f32.mrb[3].mxu0  ;;  %v1174_v32 = vadd.f32 %v1535_v31, %v1173_v17 }
 0x17b   : > { %v1201_v37 = vadd.f32 %v1174_v32, %v1171_v35 }
 0x190   : > { %v1178_v28 = vpop.f32.mrb[4].mxu0 }
 0x191   : > { %v1180_v24 = vpop.f32.mrb[5].mxu0  ;;  %v1179_v20 = vadd.f32 %v1535_v31, %v1178_v28 }
 0x192   : > { %v1181_v11 = vpop.f32.mrb[6].mxu0 }
 0x193   : > { %v1183_v13 = vpop.f32.mrb[7].mxu0  ;;  %v1202_v38 = vadd.f32 %v1201_v37, %v1179_v20  ;;  %v1182_v40 = vadd.f32 %v1535_v31, %v1181_v11 }
 0x195   : > { %v1203_v42 = vadd.f32 %v1202_v38, %v1182_v40 }
 0x196   : > { %v1186_v29 = vpop.f32.mrb[0].mxu1 }
 0x197   : > { %v1188_v30 = vpop.f32.mrb[1].mxu1  ;;  %v1187_v41 = vadd.f32 %v1535_v31, %v1186_v29 }
 0x198   : > { %v1189_v1 = vpop.f32.mrb[2].mxu1 }
 0x199   : > { %v1191_v33 = vpop.f32.mrb[3].mxu1  ;;  %v1204_v46 = vadd.f32 %v1203_v42, %v1187_v41  ;;  %v1190_v0 = vadd.f32 %v1535_v31, %v1189_v1  ;;  %v1306_v42 = vld [vmem:[%s2169_s4] sm:$0x1] }
 0x19b   : > { %v1205_v34 = vadd.f32 %v1204_v46, %v1190_v0  ;;  %v1311_v46 = vrot.slane %v1306_v42, %v2099_v50 }
 0x1a8   : > { %v1194_v2 = vpop.f32.mrb[4].mxu1 }
 0x1a9   : > { %v1195_v44 = vadd.f32 %v1535_v31, %v1194_v2  ;;  %v1196_v47 = vpop.f32.mrb[5].mxu1 }
 0x1aa   : > { %v1197_v51 = vpop.f32.mrb[6].mxu1 }
 0x1ab   : > { %v1206_v49 = vadd.f32 %v1205_v34, %v1195_v44  ;;  %v1198_v52 = vadd.f32 %v1535_v31, %v1197_v51  ;;  %v1199_v53 = vpop.f32.mrb[7].mxu1 }
 0x1ac   : > { %v1291_v53 = vld [vmem:[%s2168_s3] sm:$0x1] }
 0x1ad   : > { %v1207_v56 = vadd.f32 %v1206_v49, %v1198_v52 }
 0x1af   : > { %v1208_v57 = vrot.slane %v1207_v56, 4 }
 0x1b1   : > { %v1209_v3 = vadd.f32 %v1208_v57, %v1207_v56 }
 0x1b3   : > { %v1210_v48 = vrot.slane %v1209_v3, 2 }
 0x1b5   : > { %v1211_v58 = vadd.f32 %v1210_v48, %v1209_v3 }
 0x1b7   : > { %v1212_v59 = vrot.slane %v1211_v58, 1 }
 0x1b9   : > { %v1213_v61 = vadd.f32 %v1212_v59, %v1211_v58 }
 0x1bb   : > { %1219 = vrot.lane.b32.xlu1 %v1213_v61, %s1623_s23  ;;  %1215 = vrot.lane.b32.xlu0 %v1213_v61, %s1621_s11 }
 0x1bf   : > { %1223 = vrot.lane.b32.xlu0 %v1213_v61, %s1620_s10 }
 0x22d   : > { %v1216_v62 = vpop.permute.xlu0 %1215  ;;  %v1220_v6 = vpop.permute.xlu1 %1219 }
 0x22e   : > { %v1218_v5 = vadd.f32 %v1216_v62, %v1213_v61 }
 0x230   : > { %v1222_v14 = vadd.f32 %v1220_v6, %v1218_v5 }
 0x231   : > { %v1224_v25 = vpop.permute.xlu0 %1223 }
 0x232   : > { %v1226_v43 = vadd.f32 %v1224_v25, %v1222_v14 }
 0x234   : > { %v1228_v39 = vmul.f32 0.00390625, %v1226_v43 }
 0x236   : > { %1233 = vrot.lane.b32.xlu0 %v1228_v39, %s1623_s23  ;;  %1230 = vrot.lane.b32.xlu1 %v1228_v39, %s1620_s10 }
 0x23a   : > { %1236 = vrot.lane.b32.xlu1 %v1228_v39, %s1621_s11 }
 0x2a8   : > { %v1231_v7 = vpop.permute.xlu1 %1230  ;;  %v1234_v4 = vpop.permute.xlu0 %1233 }
 0x2a9   : > { %v1239_v8 = vsel %vm987_vm7, %v1228_v39, %v1231_v7 }
 0x2aa   : > { %v1240_v60 = vsel %vm1005_vm9, %v1239_v8, %v1234_v4 }
 0x2ac   : > { %v1237_v63 = vpop.permute.xlu1 %1236 }
 0x2ad   : > { %v1241_v26 = vsel %vm1023_vm11, %v1240_v60, %v1237_v63 }
 0x2ae   : > { %v1245_v9 = vrot.slane %v1241_v26, %v2099_v50 }
 0x2b0   : > { %v2104_v10 = vsub.f32 %v1171_v35, %v1245_v9  ;;  %v2106_v12 = vsub.f32 %v1174_v32, %v1245_v9  ;;  %v2108_v54 = vsub.f32 %v1179_v20, %v1245_v9  ;;  %v2110_v16 = vsub.f32 %v1182_v40, %v1245_v9 }
 0x2b1   : > { %v2116_v15 = vsub.f32 %v1187_v41, %v1245_v9  ;;  %v2120_v36 = vsub.f32 %v1190_v0, %v1245_v9  ;;  %v1252_v27 = vsub.f32 %v1195_v44, %v1245_v9  ;;  %v1253_v11 = vsub.f32 %v1198_v52, %v1245_v9 }
 0x2b2   : > { %v1254_v18 = vmul.f32 %v2104_v10, %v2104_v10  ;;  %v1255_v21 = vmul.f32 %v2106_v12, %v2106_v12  ;;  %v1256_v22 = vmul.f32 %v2108_v54, %v2108_v54  ;;  %v1257_v45 = vmul.f32 %v2110_v16, %v2110_v16 }
 0x2b3   : > { %v1258_v28 = vmul.f32 %v2116_v15, %v2116_v15  ;;  %v1259_v13 = vmul.f32 %v2120_v36, %v2120_v36  ;;  %v1260_v30 = vmul.f32 %v1252_v27, %v1252_v27  ;;  %v1261_v1 = vmul.f32 %v1253_v11, %v1253_v11 }
 0x2b4   : > { %v1262_v23 = vadd.f32 %v1255_v21, %v1254_v18 }
 0x2b6   : > { %v1263_v17 = vadd.f32 %v1262_v23, %v1256_v22 }
 0x2b8   : > { %v1264_v24 = vadd.f32 %v1263_v17, %v1257_v45 }
 0x2ba   : > { %v1265_v29 = vadd.f32 %v1264_v24, %v1258_v28 }
 0x2bc   : > { %v1266_v31 = vadd.f32 %v1265_v29, %v1259_v13 }
 0x2be   : > { %v1267_v32 = vadd.f32 %v1266_v31, %v1260_v30 }
 0x2c0   : > { %v1268_v33 = vadd.f32 %v1267_v32, %v1261_v1 }
 0x2c2   : > { %v1269_v35 = vrot.slane %v1268_v33, 4 }
 0x2c4   : > { %v1270_v20 = vadd.f32 %v1269_v35, %v1268_v33 }
 0x2c6   : > { %v1271_v37 = vrot.slane %v1270_v20, 2 }
 0x2c8   : > { %v1272_v38 = vadd.f32 %v1271_v37, %v1270_v20 }
 0x2ca   : > { %v1273_v40 = vrot.slane %v1272_v38, 1 }
 0x2cc   : > { %v1274_v41 = vadd.f32 %v1273_v40, %v1272_v38 }
 0x2ce   : > { %1280 = vrot.lane.b32.xlu1 %v1274_v41, %s1623_s23  ;;  %1276 = vrot.lane.b32.xlu0 %v1274_v41, %s1621_s11 }
 0x2d2   : > { %1284 = vrot.lane.b32.xlu0 %v1274_v41, %s1620_s10 }
 0x2d6   : > { %1312 = vrot.lane.b32.xlu0 %v1311_v46, %s1620_s10 }
 0x340   : > { %v1277_v0 = vpop.permute.xlu0 %1276  ;;  %v1281_v34 = vpop.permute.xlu1 %1280 }
 0x341   : > { %v1279_v2 = vadd.f32 %v1277_v0, %v1274_v41 }
 0x343   : > { %v1283_v44 = vadd.f32 %v1281_v34, %v1279_v2 }
 0x344   : > { %v1285_v47 = vpop.permute.xlu0 %1284 }
 0x345   : > { %v1287_v51 = vadd.f32 %v1285_v47, %v1283_v44 }
 0x347   : > { %v1288_v49 = vmul.f32 0.00390625, %v1287_v51 }
 0x348   : > { %v1313_v3 = vpop.permute.xlu0 %1312 }
 0x349   : > { %v1289_v52 = vadd.f32 1e-05, %v1288_v49  ;;  %v1321_v43 = vsel %vm987_vm7, %v1306_v42, %v1313_v3 }
 0x34b   : > { %1608 = vrsqrt.f32 %v1289_v52 }
 0x355   : > { %v1609_v56 = vpop.eup %1608 }
 0x356   : > { %v1292_v57 = vmul.f32 %v1609_v56, %v1291_v53 }
 0x358   : > { %1297 = vrot.lane.b32.xlu0 %v1292_v57, %s1623_s23  ;;  %1294 = vrot.lane.b32.xlu1 %v1292_v57, %s1620_s10  ;;  %s224_s10 = scalar_lea.vmem %s2170_s5, %s1551_s7 }
 0x35c   : > { %1300 = vrot.lane.b32.xlu1 %v1292_v57, %s1621_s11  ;;  %1318 = vrot.lane.b32.xlu0 %v1311_v46, %s1621_s11 }
 0x360   : > { %1315 = vrot.lane.b32.xlu1 %v1311_v46, %s1623_s23 }
 0x3ca   : > { %v1295_v48 = vpop.permute.xlu1 %1294  ;;  %v1298_v59 = vpop.permute.xlu0 %1297 }
 0x3cb   : > { %v1303_v58 = vsel %vm987_vm7, %v1292_v57, %v1295_v48 }
 0x3cc   : > { %v1304_v61 = vsel %vm1005_vm9, %v1303_v58, %v1298_v59 }
 0x3ce   : > { %v1301_v62 = vpop.permute.xlu1 %1300  ;;  %v1319_v25 = vpop.permute.xlu0 %1318 }
 0x3cf   : > { %v1305_v5 = vsel %vm1023_vm11, %v1304_v61, %v1301_v62 }
 0x3d0   : > { %v1327_v6 = vrot.slane %v1305_v5, %v2099_v50 }
 0x3d2   : > { %v1316_v14 = vpop.permute.xlu1 %1315  ;;  %v1328_v19 = vmul.f32 %v1327_v6, %v2104_v10  ;;  %v1329_v7 = vmul.f32 %v1327_v6, %v2106_v12  ;;  %v1330_v4 = vmul.f32 %v1327_v6, %v2108_v54  ;;  %v1331_v8 = vmul.f32 %v1327_v6, %v2110_v16 }
 0x3d3   : > { %v1322_v39 = vsel %vm1005_vm9, %v1321_v43, %v1316_v14  ;;  %v1332_v63 = vmul.f32 %v1327_v6, %v2116_v15  ;;  %v1333_v26 = vmul.f32 %v1327_v6, %v2120_v36  ;;  %v1334_v9 = vmul.f32 %v1327_v6, %v1252_v27 }
 0x3d4   : > { %v1323_v55 = vsel %vm1023_vm11, %v1322_v39, %v1319_v25  ;;  %v1335_v18 = vmul.f32 %v1327_v6, %v1253_v11 }
 0x3d5   : > { %v1339_v60 = vrot.slane %v1323_v55, %v2099_v50 }
 0x3d7   : > { %v1340_v21 = vadd.f32 %v1339_v60, %v1328_v19  ;;  %v1341_v22 = vadd.f32 %v1339_v60, %v1329_v7  ;;  %v1342_v10 = vadd.f32 %v1339_v60, %v1330_v4  ;;  %v1343_v23 = vadd.f32 %v1339_v60, %v1331_v8 }
 0x3d8   : > { %v1344_v12 = vadd.f32 %v1339_v60, %v1332_v63  ;;  %v1345_v54 = vadd.f32 %v1339_v60, %v1333_v26  ;;  %v1346_v16 = vadd.f32 %v1339_v60, %v1334_v9  ;;  %v1347_v45 = vadd.f32 %v1339_v60, %v1335_v18 }
 0x3d9   : > { %v1348_v17 = vmax.f32 %v1340_v21, 0.0  ;;  %v1349_v50 = vmax.f32 %v1341_v22, 0.0  ;;  %v1350_v28 = vmax.f32 %v1342_v10, 0.0  ;;  %v1351_v15 = vmax.f32 %v1343_v23, 0.0 }
 0x3da   : > { %v1352_v24 = vmax.f32 %v1344_v12, 0.0  ;;  %v1353_v36 = vmax.f32 %v1345_v54, 0.0  ;;  %v1354_v27 = vmax.f32 %v1346_v16, 0.0  ;;  %v1355_v11 = vmax.f32 %v1347_v45, 0.0 }
 0x3db   : > { %1356 = vst [vmem:[%s224_s10] sm:$0xff] %v1348_v17  ;;  %1357 = vst [vmem:[%s224_s10 + $0x8] sm:$0xff] %v1349_v50 }
 0x3dc   : > { %1358 = vst [vmem:[%s224_s10 + $0x10] sm:$0xff] %v1350_v28  ;;  %1359 = vst [vmem:[%s224_s10 + $0x18] sm:$0xff] %v1351_v15 }
 0x3dd   : > { %1360 = vst [vmem:[%s224_s10 + $0x20] sm:$0xff] %v1352_v24  ;;  %1361 = vst [vmem:[%s224_s10 + $0x28] sm:$0xff] %v1353_v36 }
 0x3de   : > { %1362 = vst [vmem:[%s224_s10 + $0x30] sm:$0xff] %v1354_v27  ;;  %1363 = vst [vmem:[%s224_s10 + $0x38] sm:$0xff] %v1355_v11 }
 0x3df PF: > { %s15_s18 = sadd.s32 1, %s1616_s18  }
 0x3e0   : > { %p12_p4 = scmp.ge.s32.totalorder %s15_s18, 4  }
 0x3e2   :  { %14 = sbr.rel (!%p12_p4) target bundleno = 1 (0x1), region = 72 }

</bundles_post_ra>
